<compile_context>
chip_gen: v7x
topology: tpu7x:2x2x1
jax: 0.10.0
libtpu: 0.0.40
codegen_flags: <defaults>
</compile_context>

<pallas_src>
import functools

import jax
import jax.numpy as jnp
from jax.experimental import pallas as pl
from jax.experimental.pallas import tpu as pltpu

_LANE = 128
_SUBLANE = 8


def _round_up(x, m):
    return ((x + m - 1) // m) * m


def _pad_axis(a, axis, new_size):
    pad = new_size - a.shape[axis]
    if pad == 0:
        return a
    widths = [(0, 0)] * a.ndim
    widths[axis] = (0, pad)
    return jnp.pad(a, widths)


def init_mlp_params(key, input_dim, hidden_dims, output_dim, dtype=jnp.float32):
    """nn.Linear-style init (uniform +/- 1/sqrt(fan_in)).

    Returns flat list [w0, b0, w1, b1, ...]; w_i: (in, out), b_i: (out,)."""
    dims = [input_dim] + list(hidden_dims) + [output_dim]
    params = []
    for i in range(len(dims) - 1):
        d_in, d_out = dims[i], dims[i + 1]
        key, kw, kb = jax.random.split(key, 3)
        bound = 1.0 / jnp.sqrt(jnp.float32(d_in))
        w = jax.random.uniform(kw, (d_in, d_out), dtype, -bound, bound)
        b = jax.random.uniform(kb, (d_out,), dtype, -bound, bound)
        params.extend([w, b])
    return params


def prepare_params(params, compute_dtype=jnp.bfloat16):
    """One-time parameter prep (run once; NOT inside the per-step forward).

    * Each layer's output dim is zero-padded to a multiple of 128 lanes (zero weights +
      zero bias -> zero activations -> ReLU(0)=0 -> zero contribution), so every matmul
      and the final store are unmasked / lane-dense.
    * Input rows of layers > 0 are zero-padded to the previous layer's padded width.
    * Weights are cast to `compute_dtype` (bf16 by default) for the MXU; biases stay f32
      and are added to the f32 accumulator.

    Returns a flat tuple (w0, b0, w1, b1, ...) of device arrays for em_mlp_forward.
    """
    num_layers = len(params) // 2
    out = []
    prev_pad = None
    for i in range(num_layers):
        w = jnp.asarray(params[2 * i])
        b = jnp.asarray(params[2 * i + 1]).reshape(1, -1)
        d_out_pad = _round_up(w.shape[1], _LANE)
        if i > 0:
            w = _pad_axis(w, 0, prev_pad)  # match previous layer's padded width
        # TODO(synk): for large non-128-multiple x/y dims, also pad the layer-0
        # contraction dim (and the x/y lane widths) for lane-dense LHS loads.
        w = _pad_axis(w, 1, d_out_pad)
        b = _pad_axis(b, 1, d_out_pad)
        out += [w.astype(compute_dtype), b.astype(jnp.float32)]
        prev_pad = d_out_pad
    return tuple(out)


def _make_mlp_kernel(num_layers: int, has_y: bool):
    """Pallas kernel: `num_layers`-deep MLP, ReLU between layers, none on the last.

    Ref order: x, (y), w0, b0, w1, b1, ..., out. Weights are pre-cast to the compute
    dtype; all accumulation is f32 (preferred_element_type)."""

    def kernel(*refs):
        o_ref = refs[-1]
        if has_y:
            x_ref, y_ref, p = refs[0], refs[1], refs[2:-1]
            # Fused first layer: concat x||y in VMEM and run a single MXU dot.
            xin = jnp.concatenate([x_ref[...], y_ref[...]], axis=-1)
        else:
            x_ref, p = refs[0], refs[1:-1]
            xin = x_ref[...]

        w0 = p[0][...]
        h = jnp.dot(xin.astype(w0.dtype), w0,
                    preferred_element_type=jnp.float32) + p[1][...]
        if num_layers > 1:
            h = jnp.maximum(h, 0.0)  # act1 = relu

        for i in range(1, num_layers):
            w = p[2 * i][...]
            b = p[2 * i + 1][...]
            h = jnp.dot(h.astype(w.dtype), w,
                        preferred_element_type=jnp.float32) + b
            if i != num_layers - 1:
                h = jnp.maximum(h, 0.0)

        o_ref[...] = h.astype(o_ref.dtype)

    return kernel


def _vmem_budget_bytes():
    """~85% of the per-core VMEM capacity (≈108 MiB v5e/v6e, ≈54 MiB v7x)."""
    try:
        cap = int(pltpu.get_tpu_info().vmem_capacity_bytes)
    except Exception:
        cap = 64 << 20  # conservative fallback (v7x per-TC VMEM)
    return int(cap * 0.85)


@functools.partial(jax.jit, static_argnames=("output_dim", "out_dtype", "batch_tile"))
def em_mlp_forward(prepped, x, y=None, *, output_dim, out_dtype=None, batch_tile=None):
    """EM_MLP_Wrapper.forward as a batch-tiled Pallas kernel.

    `prepped` is the output of prepare_params(); weights stay resident (single-buffered)
    in VMEM across the batch grid, activations stream through in (tb, D) tiles."""
    flat_params = tuple(prepped)
    num_layers = len(flat_params) // 2
    has_y = y is not None
    B, x_dim = x.shape
    y_dim = y.shape[1] if has_y else 0
    out_pad = flat_params[-1].shape[1]
    max_width = max(int(w.shape[1]) for w in flat_params[::2])
    out_dtype = x.dtype if out_dtype is None else out_dtype
    out_itemsize = jnp.dtype(out_dtype).itemsize
    in_itemsize = x.dtype.itemsize
    compute_itemsize = flat_params[0].dtype.itemsize
    param_bytes = sum(int(p.size) * p.dtype.itemsize for p in flat_params)

    # ---- VMEM budget (generation-aware) and batch tile derived from it ----
    vmem_budget = _vmem_budget_bytes()
    per_row = (2 * (x_dim + y_dim) * in_itemsize      # double-buffered input stream
               + 2 * out_pad * out_itemsize           # double-buffered output stream
               + 3 * max_width * 4                    # f32 temporaries (h / dot / bias-add)
               + max_width * compute_itemsize)        # compute-dtype cast feeding the MXU
    avail = vmem_budget - param_bytes - (4 << 20)     # params are single-buffered
    if avail < per_row * _SUBLANE:
        # TODO(synk): add a weight-streaming path (memory_space=pl.ANY weights +
        # pltpu.emit_pipeline over layers) and an fp8-weight option for MLPs whose
        # parameters do not fit in per-core VMEM (v7x: 64 MiB).
        raise ValueError("MLP parameters do not fit in VMEM; weight streaming is not "
                         "implemented in this kernel.")
    if batch_tile is None:
        tb = min(2048, (avail // per_row) // _SUBLANE * _SUBLANE)
    else:
        tb = int(batch_tile)
    tb = max(_SUBLANE, _round_up(min(tb, B), _SUBLANE))
    grid = (pl.cdiv(B, tb),)  # partial last block; no wrapper-side batch padding copy

    # ---- specs: streamed activations + resident, single-buffered parameters ----
    inputs = [x]
    in_specs = [pl.BlockSpec((tb, x_dim), lambda i: (i, 0))]
    if has_y:
        inputs.append(y)
        in_specs.append(pl.BlockSpec((tb, y_dim), lambda i: (i, 0)))
    in_specs += [
        pl.BlockSpec(p.shape, lambda i: (0, 0), pipeline_mode=pl.Buffered(1))
        for p in flat_params
    ]
    out_spec = pl.BlockSpec((tb, out_pad), lambda i: (i, 0))

    # ---- cost estimate ----
    flops = sum(2 * B * int(w.shape[0]) * int(w.shape[1]) for w in flat_params[::2])
    bytes_accessed = (B * (x_dim + y_dim) * in_itemsize
                      + B * out_pad * out_itemsize
                      + param_bytes)

    out = pl.pallas_call(
        _make_mlp_kernel(num_layers, has_y),
        out_shape=jax.ShapeDtypeStruct((B, out_pad), out_dtype),
        grid=grid,
        in_specs=in_specs,
        out_specs=out_spec,
        compiler_params=pltpu.CompilerParams(
            dimension_semantics=("parallel",),
            vmem_limit_bytes=vmem_budget,
        ),
        cost_estimate=pl.CostEstimate(
            flops=int(flops), transcendentals=0, bytes_accessed=int(bytes_accessed)
        ),
    )(*inputs, *flat_params)

    return out[:, :output_dim]


def _reference_forward(params, x, y=None):
    """Pure-JAX f32 reference matching the PyTorch module."""
    if y is not None:
        x = jnp.concatenate([x, y], axis=-1)
    num_layers = len(params) // 2
    h = x
    for i in range(num_layers):
        w, b = params[2 * i], params[2 * i + 1]
        h = h @ w + b
        if i != num_layers - 1:
            h = jnp.maximum(h, 0.0)
    return h


if __name__ == "__main__":
    # Small shapes: x (B=8, 4), y (B=8, 4) -> input_dim=8, hidden=[32, 32], output_dim=4
    batch = 8
    x_dim, y_dim = 4, 4
    input_dim = x_dim + y_dim
    hidden_dims = [32, 32]
    output_dim = 4

    key = jax.random.PRNGKey(0)
    kp, kx, ky = jax.random.split(key, 3)

    params = init_mlp_params(kp, input_dim, hidden_dims, output_dim)
    x = jax.random.normal(kx, (batch, x_dim), jnp.float32)
    y = jax.random.normal(ky, (batch, y_dim), jnp.float32)
    ref = _reference_forward(params, x, y)

    # f32 weight path: tight check vs. reference.
    prepped_f32 = prepare_params(params, compute_dtype=jnp.float32)
    out_f32 = em_mlp_forward(prepped_f32, x, y, output_dim=output_dim)
    jax.block_until_ready(out_f32)
    assert out_f32.shape == (batch, output_dim), out_f32.shape
    assert jnp.allclose(out_f32, ref, atol=1e-5, rtol=1e-5), "f32 mismatch vs. reference"

    # bf16 weight path (MXU-friendly default): loose tolerance vs. f32 reference.
    prepped_bf16 = prepare_params(params)  # bf16 weights, prepped once
    out_bf16 = em_mlp_forward(prepped_bf16, x, y, output_dim=output_dim)
    jax.block_until_ready(out_bf16)
    assert jnp.allclose(out_bf16, ref, atol=5e-2, rtol=5e-2), "bf16 mismatch vs. reference"

    # bf16 output store (narrower lane-padded writeback).
    out_bf16o = em_mlp_forward(prepped_bf16, x, y, output_dim=output_dim,
                               out_dtype=jnp.bfloat16)
    jax.block_until_ready(out_bf16o)
    assert out_bf16o.dtype == jnp.bfloat16
    assert jnp.allclose(out_bf16o.astype(jnp.float32), ref, atol=1e-1, rtol=1e-1), \
        "bf16-output mismatch vs. reference"

    # y=None path.
    params_noy = init_mlp_params(kp, x_dim, hidden_dims, output_dim)
    ref2 = _reference_forward(params_noy, x, None)
    out2 = em_mlp_forward(prepare_params(params_noy, compute_dtype=jnp.float32),
                          x, None, output_dim=output_dim)
    jax.block_until_ready(out2)
    assert jnp.allclose(out2, ref2, atol=1e-5, rtol=1e-5), "no-y mismatch vs. reference"

    # Larger batch exercising multiple grid tiles + a partial last block (no batch pad copy).
    big_b = 1000
    xb = jax.random.normal(kx, (big_b, x_dim), jnp.float32)
    yb = jax.random.normal(ky, (big_b, y_dim), jnp.float32)
    refb = _reference_forward(params, xb, yb)
    outb = em_mlp_forward(prepped_f32, xb, yb, output_dim=output_dim, batch_tile=256)
    jax.block_until_ready(outb)
    assert outb.shape == (big_b, output_dim), outb.shape
    assert jnp.allclose(outb, refb, atol=1e-4, rtol=1e-4), "tiled mismatch vs. reference"

    print("KERNEL_OK")
</pallas_src>

<mosaic_0001>
module attributes {stable_mosaic.version = 11 : i64} {
  func.func @kernel(%arg0: i32, %arg1: memref<8x4xf32, #tpu.memory_space<vmem>>, %arg2: memref<8x4xf32, #tpu.memory_space<vmem>>, %arg3: memref<8x128xf32, #tpu.memory_space<vmem>>, %arg4: memref<1x128xf32, #tpu.memory_space<vmem>>, %arg5: memref<128x128xf32, #tpu.memory_space<vmem>>, %arg6: memref<1x128xf32, #tpu.memory_space<vmem>>, %arg7: memref<128x128xf32, #tpu.memory_space<vmem>>, %arg8: memref<1x128xf32, #tpu.memory_space<vmem>>, %arg9: memref<8x128xf32, #tpu.memory_space<vmem>>) attributes {dimension_semantics = [#tpu.dimension_semantics<parallel>], iteration_bounds = array<i64: 1>, scalar_prefetch = 0 : i64, scratch_operands = 0 : i64, tpu.core_type = #tpu.core_type<tc>, window_params = [{transform_indices = @transform_0, window_bounds = array<i64: 8, 4>}, {transform_indices = @transform_1, window_bounds = array<i64: 8, 4>}, {pipeline_mode = #tpu.pipeline_mode<synchronous>, transform_indices = @transform_2, window_bounds = array<i64: 8, 128>}, {pipeline_mode = #tpu.pipeline_mode<synchronous>, transform_indices = @transform_3, window_bounds = array<i64: 1, 128>}, {pipeline_mode = #tpu.pipeline_mode<synchronous>, transform_indices = @transform_4, window_bounds = array<i64: 128, 128>}, {pipeline_mode = #tpu.pipeline_mode<synchronous>, transform_indices = @transform_5, window_bounds = array<i64: 1, 128>}, {pipeline_mode = #tpu.pipeline_mode<synchronous>, transform_indices = @transform_6, window_bounds = array<i64: 128, 128>}, {pipeline_mode = #tpu.pipeline_mode<synchronous>, transform_indices = @transform_7, window_bounds = array<i64: 1, 128>}, {transform_indices = @transform_8, window_bounds = array<i64: 8, 128>}]} {
    %c0 = arith.constant 0 : index
    %c0_0 = arith.constant 0 : index
    %0 = vector.load %arg1[%c0, %c0_0] : memref<8x4xf32, #tpu.memory_space<vmem>>, vector<8x4xf32>
    %c0_1 = arith.constant 0 : index
    %c0_2 = arith.constant 0 : index
    %1 = vector.load %arg2[%c0_1, %c0_2] : memref<8x4xf32, #tpu.memory_space<vmem>>, vector<8x4xf32>
    %2 = tpu.concatenate %0, %1 in 1 : vector<8x4xf32>, vector<8x4xf32> -> vector<8x8xf32>
    %c0_3 = arith.constant 0 : index
    %c0_4 = arith.constant 0 : index
    %3 = vector.load %arg3[%c0_3, %c0_4] : memref<8x128xf32, #tpu.memory_space<vmem>>, vector<8x128xf32>
    %cst = arith.constant dense<0.000000e+00> : vector<8x128xf32>
    %4 = tpu.matmul %2, %3, %cst {dimension_numbers = #tpu.dot_dimension_numbers<[1], [0], [0], [1], [0, 0, 1, 1], [], []>} : vector<8x8xf32>, vector<8x128xf32>, vector<8x128xf32> -> vector<8x128xf32>
    %c0_5 = arith.constant 0 : index
    %c0_6 = arith.constant 0 : index
    %5 = vector.load %arg4[%c0_5, %c0_6] : memref<1x128xf32, #tpu.memory_space<vmem>>, vector<1x128xf32>
    %6 = vector.broadcast %5 : vector<1x128xf32> to vector<8x128xf32>
    %7 = arith.addf %4, %6 : vector<8x128xf32>
    %cst_7 = arith.constant 0.000000e+00 : f32
    %8 = vector.broadcast %cst_7 : f32 to vector<8x128xf32>
    %9 = arith.maximumf %7, %8 : vector<8x128xf32>
    %c0_8 = arith.constant 0 : index
    %c0_9 = arith.constant 0 : index
    %10 = vector.load %arg5[%c0_8, %c0_9] : memref<128x128xf32, #tpu.memory_space<vmem>>, vector<128x128xf32>
    %c0_10 = arith.constant 0 : index
    %c0_11 = arith.constant 0 : index
    %11 = vector.load %arg6[%c0_10, %c0_11] : memref<1x128xf32, #tpu.memory_space<vmem>>, vector<1x128xf32>
    %cst_12 = arith.constant dense<0.000000e+00> : vector<8x128xf32>
    %12 = tpu.matmul %9, %10, %cst_12 {dimension_numbers = #tpu.dot_dimension_numbers<[1], [0], [0], [1], [0, 0, 1, 1], [], []>} : vector<8x128xf32>, vector<128x128xf32>, vector<8x128xf32> -> vector<8x128xf32>
    %13 = vector.broadcast %11 : vector<1x128xf32> to vector<8x128xf32>
    %14 = arith.addf %12, %13 : vector<8x128xf32>
    %cst_13 = arith.constant 0.000000e+00 : f32
    %15 = vector.broadcast %cst_13 : f32 to vector<8x128xf32>
    %16 = arith.maximumf %14, %15 : vector<8x128xf32>
    %c0_14 = arith.constant 0 : index
    %c0_15 = arith.constant 0 : index
    %17 = vector.load %arg7[%c0_14, %c0_15] : memref<128x128xf32, #tpu.memory_space<vmem>>, vector<128x128xf32>
    %c0_16 = arith.constant 0 : index
    %c0_17 = arith.constant 0 : index
    %18 = vector.load %arg8[%c0_16, %c0_17] : memref<1x128xf32, #tpu.memory_space<vmem>>, vector<1x128xf32>
    %cst_18 = arith.constant dense<0.000000e+00> : vector<8x128xf32>
    %19 = tpu.matmul %16, %17, %cst_18 {dimension_numbers = #tpu.dot_dimension_numbers<[1], [0], [0], [1], [0, 0, 1, 1], [], []>} : vector<8x128xf32>, vector<128x128xf32>, vector<8x128xf32> -> vector<8x128xf32>
    %20 = vector.broadcast %18 : vector<1x128xf32> to vector<8x128xf32>
    %21 = arith.addf %19, %20 : vector<8x128xf32>
    %c0_19 = arith.constant 0 : index
    %c0_20 = arith.constant 0 : index
    %22 = vector.load %arg9[%c0_19, %c0_20] : memref<8x128xf32, #tpu.memory_space<vmem>>, vector<8x128xf32>
    tpu.vector_store %arg9[%c0_19, %c0_20], %21 {strides = array<i32>} : memref<8x128xf32, #tpu.memory_space<vmem>>, vector<8x128xf32>,
    return
  }
  func.func @transform_0(%arg0: i32) -> (i32, i32) {
    %c0_i32 = arith.constant 0 : i32
    %c0_i32_0 = arith.constant 0 : i32
    return %arg0, %c0_i32 : i32, i32
  }
  func.func @transform_1(%arg0: i32) -> (i32, i32) {
    %c0_i32 = arith.constant 0 : i32
    %c0_i32_0 = arith.constant 0 : i32
    return %arg0, %c0_i32 : i32, i32
  }
  func.func @transform_2(%arg0: i32) -> (i32, i32) {
    %c0_i32 = arith.constant 0 : i32
    %c0_i32_0 = arith.constant 0 : i32
    %c0_i32_1 = arith.constant 0 : i32
    return %c0_i32, %c0_i32_0 : i32, i32
  }
  func.func @transform_3(%arg0: i32) -> (i32, i32) {
    %c0_i32 = arith.constant 0 : i32
    %c0_i32_0 = arith.constant 0 : i32
    %c0_i32_1 = arith.constant 0 : i32
    return %c0_i32, %c0_i32_0 : i32, i32
  }
  func.func @transform_4(%arg0: i32) -> (i32, i32) {
    %c0_i32 = arith.constant 0 : i32
    %c0_i32_0 = arith.constant 0 : i32
    %c0_i32_1 = arith.constant 0 : i32
    return %c0_i32, %c0_i32_0 : i32, i32
  }
  func.func @transform_5(%arg0: i32) -> (i32, i32) {
    %c0_i32 = arith.constant 0 : i32
    %c0_i32_0 = arith.constant 0 : i32
    %c0_i32_1 = arith.constant 0 : i32
    return %c0_i32, %c0_i32_0 : i32, i32
  }
  func.func @transform_6(%arg0: i32) -> (i32, i32) {
    %c0_i32 = arith.constant 0 : i32
    %c0_i32_0 = arith.constant 0 : i32
    %c0_i32_1 = arith.constant 0 : i32
    return %c0_i32, %c0_i32_0 : i32, i32
  }
  func.func @transform_7(%arg0: i32) -> (i32, i32) {
    %c0_i32 = arith.constant 0 : i32
    %c0_i32_0 = arith.constant 0 : i32
    %c0_i32_1 = arith.constant 0 : i32
    return %c0_i32, %c0_i32_0 : i32, i32
  }
  func.func @transform_8(%arg0: i32) -> (i32, i32) {
    %c0_i32 = arith.constant 0 : i32
    %c0_i32_0 = arith.constant 0 : i32
    return %arg0, %c0_i32 : i32, i32
  }
}

</mosaic_0001>

<bundles_post_ra>
// kernel: em_mlp_forward.1
= control target key start
LH: loop header
LB: loop body
LE: loop exit
PB: predicated region body
PF: predicated region fallthrough
CT: control target
= control target key end

     0   :  { %13 = vsyncpa [#allocation3], 0  ;;  %s678_s0 = inlined_call_operand.vmem [shape: f32[8,4], index: 0, kind: input, shape index: {}]   ;;  %s679_s1 = inlined_call_operand.vmem [shape: f32[8,4], index: 1, kind: input, shape index: {}]   ;;  %s680_s2 = inlined_call_operand.vmem [shape: f32[8,128], index: 2, kind: input, shape index: {}]   ;;  %s681_s3 = inlined_call_operand.vmem [shape: f32[1,128], index: 3, kind: input, shape index: {}]   ;;  %s682_s4 = inlined_call_operand.hbm [shape: f32[128,128], index: 4, kind: input, shape index: {}]   ;;  %s683_s5 = inlined_call_operand.vmem [shape: f32[1,128], index: 5, kind: input, shape index: {}]   ;;  %s684_s6 = inlined_call_operand.hbm [shape: f32[128,128], index: 6, kind: input, shape index: {}]   ;;  %s685_s7 = inlined_call_operand.vmem [shape: f32[1,128], index: 7, kind: input, shape index: {}]   ;;  %s686_s8 = inlined_call_operand.vmem [shape: f32[8,128], index: 8, kind: output, shape index: {}]  }
   0x1   :  { %14 = vsyncpa [#allocation5], 0  ;;  %s561_s27 = smov [#allocation2]   ;;  %s513_s9 = scalar_lea.hbm %s682_s4, 2048 }
   0x2   :  { %s28_s28 = sshll.u32 %s561_s27, 4  ;;  %p514_p0 = scmp.ne.s32.totalorder %s682_s4, %s513_s9  ;;  %s29_s28 = int_to_ptr.vmem [resolvable:$true] %s28_s28 }
   0x3   :  { %p517_p1 = scmp.lt.u32.totalorder %s513_s9, %s682_s4 }
   0x5   :  { %p519_p2 = pnand %p517_p1, %p514_p0 }
   0x7   :  { %522 = shalt.err (!%p519_p2)
}
   0x8   :  { %s523_s14 = scalar_lea.vmem %s29_s28, 2048  ;;  %p528_p4 = scmp.lt.s32.totalorder %s29_s28, %s29_s28 }
   0x9   :  { %p524_p3 = scmp.ne.s32.totalorder %s29_s28, %s523_s14  ;;  %p529_p5 = scmp.lt.s32.totalorder %s523_s14, %s523_s14 }
   0xb   :  { %p530_p6 = por %p529_p5, %p528_p4 }
   0xd   :  { %p531_p7 = pnand %p530_p6, %p524_p3 }
   0xf   :  { %534 = shalt.err (!%p531_p7)
}
  0x10   :  { %s562_s15 = smov 128   ;;  %s563_s16 = smov 8  }
  0x11   :  { %34 = dma.hbm_to_vmem [thread:$0]  %s682_s4, 2048, %s29_s28, [#allocation3], %s562_s15, %s562_s15, %s563_s16  }
  0x12   :  { %s564_s19 = smov [#allocation4]   ;;  %s535_s23 = scalar_lea.hbm %s684_s6, 2048 }
  0x13   :  { %s42_s20 = sshll.u32 %s564_s19, 4  ;;  %p536_p8 = scmp.ne.s32.totalorder %s684_s6, %s535_s23  ;;  %s43_s20 = int_to_ptr.vmem [resolvable:$true] %s42_s20 }
  0x14   :  { %p539_p9 = scmp.lt.u32.totalorder %s535_s23, %s684_s6 }
  0x16   :  { %p541_p10 = pnand %p539_p9, %p536_p8 }
  0x18   :  { %544 = shalt.err (!%p541_p10)
}
  0x19   :  { %s545_s29 = scalar_lea.vmem %s43_s20, 2048  ;;  %p550_p12 = scmp.lt.s32.totalorder %s43_s20, %s43_s20 }
  0x1a   :  { %p546_p11 = scmp.ne.s32.totalorder %s43_s20, %s545_s29  ;;  %p551_p13 = scmp.lt.s32.totalorder %s545_s29, %s545_s29 }
  0x1c   :  { %p552_p0 = por %p551_p13, %p550_p12 }
  0x1e   :  { %p553_p1 = pnand %p552_p0, %p546_p11 }
  0x20   :  { %556 = shalt.err (!%p553_p1)
}
  0x21   :  { %48 = dma.hbm_to_vmem [thread:$0]  %s684_s6, 2048, %s43_s20, [#allocation5], %s562_s15, %s562_s15, %s563_s16  }
  0x22   :  { %557 = dma.done.wait [#allocation3], 2048  }
  0x23   :  { %558 = vsyncadd [#allocation3], 4294965248 }
  0x24   :  { %559 = dma.done.wait [#allocation5], 2048  }
  0x25   :  { %560 = vsyncadd [#allocation5], 4294965248  ;;  %v565_v0 = vmov 0.0   ;;  %vm566_vm0 = vmmov 0   ;;  %v567_v1 = vmov 0.0|0.0   ;;  %v58_v2 = vld [vmem:[%s679_s1] sm:$0xff] }
  0x26   :  { %382 = vmatprep.subr.mxu0 %v565_v0  ;;  %384 = vmatprep.mubr.msk.f32.mxu0 %vm566_vm0, %v565_v0  ;;  %v65_v3 = vld [vmem:[%s680_s2] sm:$0xff]  ;;  %s568_s11 = smov 4   ;;  %v149_v5 = vld [vmem:[#allocation2 + $0x8] sm:$0xff]  ;;  %v150_v6 = vld [vmem:[#allocation2 + $0x10] sm:$0xff]  ;;  %vm63_vm1 = vcmask 31744   ;;  %vm73_vm2 = vcmask 64512  }
  0x27   :  { %457 = vmatprep.subr.bf16.mxu1 %v567_v1  ;;  %419 = vmatprep.mubr.msk.f32.mxu1 %vm566_vm0, %v565_v0  ;;  %v148_v4 = vld [vmem:[#allocation2] sm:$0xff]  ;;  %v151_v8 = vld [vmem:[#allocation2 + $0x18] sm:$0xff]  ;;  %v153_v11 = vld [vmem:[#allocation2 + $0x28] sm:$0xff] }
  0x28   :  { %60 = vrot.lane.b32.xlu0 %v58_v2, %s568_s11  ;;  %383 = vmatpush3.msra.mxu0 %v65_v3  ;;  %v458_v7 = vpack.c.bf16 %v149_v5, %v148_v4  ;;  %v461_v9 = vpack.c.bf16 %v151_v8, %v150_v6  ;;  %v152_v10 = vld [vmem:[#allocation2 + $0x20] sm:$0xff]  ;;  %v154_v13 = vld [vmem:[#allocation2 + $0x30] sm:$0xff]  ;;  %v155_v14 = vld [vmem:[#allocation2 + $0x38] sm:$0xff] }
  0x29   :  { %481 = vmatprep.subr.bf16.mxu0 %v567_v1  ;;  %v464_v12 = vpack.c.bf16 %v153_v11, %v152_v10  ;;  %v467_v15 = vpack.c.bf16 %v155_v14, %v154_v13  ;;  %v156_v16 = vld [vmem:[#allocation2 + $0x40] sm:$0xff]  ;;  %v157_v17 = vld [vmem:[#allocation2 + $0x48] sm:$0xff]  ;;  %v158_v19 = vld [vmem:[#allocation2 + $0x50] sm:$0xff] }
  0x2a   :  { %459 = vmatpush3.bf16.msra.mxu1 %v458_v7  ;;  %v470_v18 = vpack.c.bf16 %v157_v17, %v156_v16  ;;  %v159_v20 = vld [vmem:[#allocation2 + $0x58] sm:$0xff]  ;;  %v160_v22 = vld [vmem:[#allocation2 + $0x60] sm:$0xff]  ;;  %v161_v23 = vld [vmem:[#allocation2 + $0x68] sm:$0xff] }
  0x2b   :  { %460 = vmatprep.subr.bf16.mxu1 %v567_v1  ;;  %v473_v21 = vpack.c.bf16 %v159_v20, %v158_v19  ;;  %v476_v24 = vpack.c.bf16 %v161_v23, %v160_v22  ;;  %v57_v25 = vld [vmem:[%s678_s0] sm:$0xff]  ;;  %v162_v28 = vld [vmem:[#allocation2 + $0x70] sm:$0xff]  ;;  %v163_v29 = vld [vmem:[#allocation2 + $0x78] sm:$0xff] }
  0x2c   :  { %v479_v30 = vpack.c.bf16 %v163_v29, %v162_v28  ;;  %v242_v31 = vld [vmem:[#allocation4] sm:$0xff]  ;;  %v243_v32 = vld [vmem:[#allocation4 + $0x8] sm:$0xff]  ;;  %v244_v33 = vld [vmem:[#allocation4 + $0x10] sm:$0xff] }
  0x2d   :  { %v482_v34 = vpack.c.bf16 %v243_v32, %v242_v31  ;;  %v245_v35 = vld [vmem:[#allocation4 + $0x18] sm:$0xff]  ;;  %v246_v37 = vld [vmem:[#allocation4 + $0x20] sm:$0xff]  ;;  %v247_v38 = vld [vmem:[#allocation4 + $0x28] sm:$0xff] }
  0x2e   :  { %462 = vmatpush3.bf16.msra.mxu1 %v461_v9  ;;  %v485_v36 = vpack.c.bf16 %v245_v35, %v244_v33  ;;  %v488_v39 = vpack.c.bf16 %v247_v38, %v246_v37  ;;  %v248_v40 = vld [vmem:[#allocation4 + $0x30] sm:$0xff]  ;;  %v249_v41 = vld [vmem:[#allocation4 + $0x38] sm:$0xff]  ;;  %v250_v43 = vld [vmem:[#allocation4 + $0x40] sm:$0xff] }
  0x2f   :  { %463 = vmatprep.subr.bf16.mxu1 %v567_v1  ;;  %v491_v42 = vpack.c.bf16 %v249_v41, %v248_v40  ;;  %v251_v44 = vld [vmem:[#allocation4 + $0x48] sm:$0xff]  ;;  %v252_v46 = vld [vmem:[#allocation4 + $0x50] sm:$0xff]  ;;  %v253_v47 = vld [vmem:[#allocation4 + $0x58] sm:$0xff] }
  0x30   :  { %v494_v45 = vpack.c.bf16 %v251_v44, %v250_v43  ;;  %v497_v48 = vpack.c.bf16 %v253_v47, %v252_v46  ;;  %v254_v49 = vld [vmem:[#allocation4 + $0x60] sm:$0xff]  ;;  %v255_v50 = vld [vmem:[#allocation4 + $0x68] sm:$0xff]  ;;  %v256_v57 = vld [vmem:[#allocation4 + $0x70] sm:$0xff] }
  0x31   :  { %v500_v51 = vpack.c.bf16 %v255_v50, %v254_v49  ;;  %v342_v52 = vld [vmem:[%s681_s3] ss:$0 sm:$0xff]  ;;  %v257_v58 = vld [vmem:[#allocation4 + $0x78] sm:$0xff] }
  0x32   :  { %465 = vmatpush3.bf16.msra.mxu1 %v464_v12  ;;  %v503_v59 = vpack.c.bf16 %v257_v58, %v256_v57  ;;  %v344_v60 = vld [vmem:[%s683_s5] ss:$0 sm:$0xff] }
  0x33   :  { %466 = vmatprep.subr.bf16.mxu1 %v567_v1 }
  0x36   :  { %468 = vmatpush3.bf16.msra.mxu1 %v467_v15 }
  0x37   :  { %469 = vmatprep.subr.bf16.mxu1 %v567_v1 }
  0x3a   :  { %471 = vmatpush3.bf16.msra.mxu1 %v470_v18 }
  0x3b   :  { %472 = vmatprep.subr.bf16.mxu1 %v567_v1 }
  0x3e   :  { %474 = vmatpush3.bf16.msra.mxu1 %v473_v21 }
  0x3f   :  { %475 = vmatprep.subr.bf16.mxu1 %v567_v1 }
  0x42   :  { %477 = vmatpush3.bf16.msra.mxu1 %v476_v24 }
  0x43   :  { %478 = vmatprep.subr.bf16.mxu1 %v567_v1 }
  0x46   :  { %480 = vmatpush3.bf16.msra.mxu1 %v479_v30 }
  0x9a   :  { %v61_v26 = vpop.permute.xlu0 %60 }
  0x9b   :  { %v64_v27 = vsel %vm63_vm1, %v57_v25, %v61_v26 }
  0x9c   :  { %385 = vmatmul.mubr.msk.f32.vlgmr.msra.gmra.mrb[0].mxu0 %vm73_vm2, %v64_v27 }
  0x9d   :  { %454 = vmatprep.mubr.msk.f32.mxu0 %vm566_vm0, %v565_v0  ;;  %483 = vmatpush3.bf16.msra.mxu0 %v482_v34 }
  0x9e   :  { %484 = vmatprep.subr.bf16.mxu0 %v567_v1 }
  0xa1   :  { %486 = vmatpush3.bf16.msra.mxu0 %v485_v36 }
  0xa2   :  { %487 = vmatprep.subr.bf16.mxu0 %v567_v1 }
  0xa5   :  { %489 = vmatpush3.bf16.msra.mxu0 %v488_v39 }
  0xa6   :  { %490 = vmatprep.subr.bf16.mxu0 %v567_v1 }
  0xa9   :  { %492 = vmatpush3.bf16.msra.mxu0 %v491_v42 }
  0xaa   :  { %493 = vmatprep.subr.bf16.mxu0 %v567_v1 }
  0xad   :  { %495 = vmatpush3.bf16.msra.mxu0 %v494_v45 }
  0xae   :  { %496 = vmatprep.subr.bf16.mxu0 %v567_v1 }
  0xb1   :  { %498 = vmatpush3.bf16.msra.mxu0 %v497_v48 }
  0xb2   :  { %499 = vmatprep.subr.bf16.mxu0 %v567_v1 }
  0xb5   :  { %501 = vmatpush3.bf16.msra.mxu0 %v500_v51 }
  0xb6   :  { %502 = vmatprep.subr.bf16.mxu0 %v567_v1  ;;  %v345_v1 = vld [vmem:[%s685_s7] ss:$0 sm:$0xff] }
  0xb9   :  { %504 = vmatpush3.bf16.msra.mxu0 %v503_v59 }
 0x16f   :  { %v143_v53 = vpop.f32.mrb[0].mxu0 }
 0x170   :  { %v144_v54 = vadd.f32 %v342_v52, %v143_v53  ;;  %v386_v55 = vpop.f32.mrb[1].mxu0 }
 0x172   :  { %v147_v56 = vmax.f32 %v144_v54, 0.0 }
 0x174   :  { %420 = vmatmul.mubr.f32.vlgmr.msra.gmra.mrb[0].mxu1 %v147_v56 }
 0x247   :  { %v237_v61 = vpop.f32.mrb[0].mxu1 }
 0x248   :  { %v238_v62 = vadd.f32 %v344_v60, %v237_v61  ;;  %v421_v63 = vpop.f32.mrb[1].mxu1 }
 0x24a   :  { %v241_v0 = vmax.f32 %v238_v62, 0.0 }
 0x24c   :  { %455 = vmatmul.mubr.f32.vlgmr.msra.gmra.mrb[2].mxu0 %v241_v0 }
 0x31f   :  { %v331_v2 = vpop.f32.mrb[2].mxu0 }
 0x320   :  { %v332_v3 = vadd.f32 %v345_v1, %v331_v2  ;;  %v456_v4 = vpop.f32.mrb[3].mxu0 }
 0x322   :  { %335 = vst [vmem:[%s686_s8] sm:$0xff] %v332_v3 }
 0x323   :  { %340 = vsyncpa [#allocation3], 1 }
 0x324   :  { %341 = vsyncpa [#allocation5], 1 }

</bundles_post_ra>
